<compile_context>
chip_gen: v7x
topology: tpu7x:2x2x1
jax: 0.10.0
libtpu: 0.0.40
codegen_flags: <defaults>
</compile_context>

<pallas_src>
import functools

import jax
import jax.numpy as jnp
from jax.experimental import pallas as pl
from jax.experimental.pallas import tpu as pltpu

_NEG_BIG = -1e30  # finite large-negative bias for padded vocab columns (avoids inf*0=nan)


def _round_up(x, m):
    return (x + m - 1) // m * m


def _nvil_kernel(x_ref, w_ref, b_ref, g_ref, scores_ref, stats_ref):
    tile_b, v_pad = scores_ref.shape

    # ---- agent: Linear(input_size -> vocab) on the MXU (bf16 in, f32 accumulate) ----
    scores = jnp.dot(x_ref[...], w_ref[...],
                     preferred_element_type=jnp.float32) + b_ref[...]
    scores_ref[...] = scores

    # ---- Categorical(logits).entropy():  H = lse - sum(e*z)/sum(e), reusing exp(z) ----
    m = jnp.max(scores, axis=-1, keepdims=True)
    z = scores - m
    e = jnp.exp(z)                                   # padded cols: exp(~-1e30) == 0 exactly
    denom = jnp.sum(e, axis=-1, keepdims=True)
    entropy = jnp.log(denom) - jnp.sum(e * z, axis=-1, keepdims=True) / denom

    # ---- sample ~ Categorical(logits) via Gumbel-max ----
    # lax.argmax_p has no guaranteed Mosaic/interpret lowering, so synthesize the argmax
    # with the lane iota (shared with the stats packing below): max, then min winning lane.
    lane = jax.lax.broadcasted_iota(jnp.int32, (tile_b, v_pad), 1)
    perturbed = scores + g_ref[...]
    pmax = jnp.max(perturbed, axis=-1, keepdims=True)
    sample = jnp.min(jnp.where(perturbed >= pmax, lane, v_pad),
                     axis=-1, keepdims=True)

    # ---- pack (entropy, sample) into one lane-dense (tile_b, 128) f32 slab ----
    stat_lane = lane if v_pad == stats_ref.shape[1] else jax.lax.broadcasted_iota(
        jnp.int32, stats_ref.shape, 1)
    stats_ref[...] = jnp.where(
        stat_lane == 0, entropy,
        jnp.where(stat_lane == 1, sample.astype(jnp.float32), 0.0))


def _pick_tile_b(b):
    # Multiple of 256 (v6e/v7x MXU rows, also a multiple of v5e's 128).  With K=1024
    # bf16 inputs this is ~0.5 MiB per x buffer (~2 MiB total double-buffered), far
    # below the v7x 32 MiB scoped-VMEM default.
    if b >= 256:
        return 256
    return _round_up(b, 8)


@functools.partial(jax.jit)
def nvil_forward(image, w, b, key):
    """image: (B, C, H, W); w: (input_size, V); b: (V,) or (1, V); key: jax PRNG key."""
    B = image.shape[0]
    K, V = w.shape
    x = image.reshape(B, K)                          # image.view(-1, input_size)

    V_pad = _round_up(V, 128)
    TILE_B = _pick_tile_b(B)
    B_pad = _round_up(B, TILE_B)

    # bf16 operands for the MXU; accumulation stays f32 inside the kernel.
    x_p = jnp.pad(x.astype(jnp.bfloat16), ((0, B_pad - B), (0, 0)))
    w_p = jnp.pad(w.astype(jnp.bfloat16), ((0, 0), (0, V_pad - V)))
    b_p = jnp.pad(jnp.asarray(b, jnp.float32).reshape(1, V),
                  ((0, 0), (0, V_pad - V)), constant_values=_NEG_BIG)

    # Host/XLA-side Gumbel noise, one independent row per (padded) batch element.
    g = jax.random.gumbel(key, (B_pad, V_pad), dtype=jnp.float32)

    grid = (B_pad // TILE_B,)
    scores_p, stats = pl.pallas_call(
        _nvil_kernel,
        grid=grid,
        in_specs=[
            pl.BlockSpec((TILE_B, K), lambda i: (i, 0)),       # x tile (pipelined)
            pl.BlockSpec((K, V_pad), lambda i: (0, 0)),        # w resident
            pl.BlockSpec((1, V_pad), lambda i: (0, 0)),        # b resident
            pl.BlockSpec((TILE_B, V_pad), lambda i: (i, 0)),   # gumbel tile
        ],
        out_specs=(
            pl.BlockSpec((TILE_B, V_pad), lambda i: (i, 0)),   # scores (lane-dense)
            pl.BlockSpec((TILE_B, 128), lambda i: (i, 0)),     # packed entropy/sample
        ),
        out_shape=(
            jax.ShapeDtypeStruct((B_pad, V_pad), jnp.float32),
            jax.ShapeDtypeStruct((B_pad, 128), jnp.float32),
        ),
        compiler_params=pltpu.CompilerParams(
            dimension_semantics=("parallel",),
            vmem_limit_bytes=32 * 1024 * 1024,
        ),
        cost_estimate=pl.CostEstimate(
            flops=2 * B_pad * K * V_pad,
            transcendentals=B_pad * V_pad,
            bytes_accessed=(B_pad * K * 2 + K * V_pad * 2 + V_pad * 4
                            + 2 * B_pad * V_pad * 4 + B_pad * 128 * 4),
        ),
    )(x_p, w_p, b_p, g)

    scores = scores_p[:B, :V]
    entropy = stats[:B, 0]
    sample = stats[:B, 1].astype(jnp.int32)
    return sample, scores, entropy


if __name__ == "__main__":
    root = jax.random.PRNGKey(0)
    k_x, k_w, k_b, k_s = jax.random.split(root, 4)

    B, C, H, W = 2, 4, 16, 16          # image (NCHW)
    input_size = C * H * W             # 1024
    V = 32                             # vocab / number of categories

    image = jax.random.normal(k_x, (B, C, H, W), dtype=jnp.float32)
    w = jax.random.normal(k_w, (input_size, V), dtype=jnp.float32) * (input_size ** -0.5)
    b = jax.random.normal(k_b, (V,), dtype=jnp.float32) * 0.01

    sample, scores, entropy = nvil_forward(image, w, b, k_s)
    jax.block_until_ready((sample, scores, entropy))

    # reference with the same bf16-input / f32-accumulate matmul as the kernel
    x_flat = image.reshape(B, input_size)
    ref_scores = jnp.dot(x_flat.astype(jnp.bfloat16), w.astype(jnp.bfloat16),
                         preferred_element_type=jnp.float32) + b[None, :]
    ref_logp = jax.nn.log_softmax(ref_scores, axis=-1)
    ref_entropy = -jnp.sum(jnp.exp(ref_logp) * ref_logp, axis=-1)

    assert sample.shape == (B,) and scores.shape == (B, V) and entropy.shape == (B,)
    assert sample.dtype == jnp.int32
    assert jnp.allclose(scores, ref_scores, atol=5e-3, rtol=5e-3)
    assert jnp.allclose(entropy, ref_entropy, atol=5e-3, rtol=5e-3)
    assert bool(jnp.all((sample >= 0) & (sample < V)))

    print("KERNEL_OK")
</pallas_src>

<mosaic_0001>
module attributes {stable_mosaic.version = 11 : i64} {
  func.func @_nvil_kernel(%arg0: i32, %arg1: memref<8x1024xbf16, #tpu.memory_space<vmem>>, %arg2: memref<1024x128xbf16, #tpu.memory_space<vmem>>, %arg3: memref<1x128xf32, #tpu.memory_space<vmem>>, %arg4: memref<8x128xf32, #tpu.memory_space<vmem>>, %arg5: memref<8x128xf32, #tpu.memory_space<vmem>>, %arg6: memref<8x128xf32, #tpu.memory_space<vmem>>) attributes {dimension_semantics = [#tpu.dimension_semantics<parallel>], iteration_bounds = array<i64: 1>, scalar_prefetch = 0 : i64, scratch_operands = 0 : i64, tpu.core_type = #tpu.core_type<tc>, window_params = [{transform_indices = @transform_0, window_bounds = array<i64: 8, 1024>}, {pipeline_mode = #tpu.pipeline_mode<synchronous>, transform_indices = @transform_1, window_bounds = array<i64: 1024, 128>}, {pipeline_mode = #tpu.pipeline_mode<synchronous>, transform_indices = @transform_2, window_bounds = array<i64: 1, 128>}, {transform_indices = @transform_3, window_bounds = array<i64: 8, 128>}, {transform_indices = @transform_4, window_bounds = array<i64: 8, 128>}, {transform_indices = @transform_5, window_bounds = array<i64: 8, 128>}]} {
    %c0 = arith.constant 0 : index
    %c0_0 = arith.constant 0 : index
    %0 = vector.load %arg1[%c0, %c0_0] : memref<8x1024xbf16, #tpu.memory_space<vmem>>, vector<8x1024xbf16>
    %c0_1 = arith.constant 0 : index
    %c0_2 = arith.constant 0 : index
    %1 = vector.load %arg2[%c0_1, %c0_2] : memref<1024x128xbf16, #tpu.memory_space<vmem>>, vector<1024x128xbf16>
    %cst = arith.constant dense<0.000000e+00> : vector<8x128xf32>
    %2 = tpu.matmul %0, %1, %cst {dimension_numbers = #tpu.dot_dimension_numbers<[1], [0], [0], [1], [0, 0, 1, 1], [], []>} : vector<8x1024xbf16>, vector<1024x128xbf16>, vector<8x128xf32> -> vector<8x128xf32>
    %c0_3 = arith.constant 0 : index
    %c0_4 = arith.constant 0 : index
    %3 = vector.load %arg3[%c0_3, %c0_4] : memref<1x128xf32, #tpu.memory_space<vmem>>, vector<1x128xf32>
    %4 = vector.broadcast %3 : vector<1x128xf32> to vector<8x128xf32>
    %5 = arith.addf %2, %4 : vector<8x128xf32>
    %c0_5 = arith.constant 0 : index
    %c0_6 = arith.constant 0 : index
    %6 = vector.load %arg5[%c0_5, %c0_6] : memref<8x128xf32, #tpu.memory_space<vmem>>, vector<8x128xf32>
    tpu.vector_store %arg5[%c0_5, %c0_6], %5 {strides = array<i32>} : memref<8x128xf32, #tpu.memory_space<vmem>>, vector<8x128xf32>,
    %cst_7 = arith.constant dense<0xFF800000> : vector<8xf32>
    %7 = vector.multi_reduction <maximumf>, %5, %cst_7 [1] : vector<8x128xf32> to vector<8xf32>
    %8 = vector.shape_cast %7 : vector<8xf32> to vector<8x1xf32>
    %9 = vector.broadcast %8 : vector<8x1xf32> to vector<8x128xf32>
    %10 = arith.subf %5, %9 : vector<8x128xf32>
    %11 = math.exp %10 : vector<8x128xf32>
    %cst_8 = arith.constant dense<0.000000e+00> : vector<8xf32>
    %12 = vector.multi_reduction <add>, %11, %cst_8 [1] : vector<8x128xf32> to vector<8xf32>
    %13 = vector.shape_cast %12 : vector<8xf32> to vector<8x1xf32>
    %14 = math.log %13 : vector<8x1xf32>
    %15 = arith.mulf %11, %10 : vector<8x128xf32>
    %cst_9 = arith.constant dense<0.000000e+00> : vector<8xf32>
    %16 = vector.multi_reduction <add>, %15, %cst_9 [1] : vector<8x128xf32> to vector<8xf32>
    %17 = vector.shape_cast %16 : vector<8xf32> to vector<8x1xf32>
    %18 = arith.divf %17, %13 : vector<8x1xf32>
    %19 = arith.subf %14, %18 : vector<8x1xf32>
    %20 = tpu.iota {dimensions = array<i32: 1>} : vector<8x128xi32>
    %c0_10 = arith.constant 0 : index
    %c0_11 = arith.constant 0 : index
    %21 = vector.load %arg4[%c0_10, %c0_11] : memref<8x128xf32, #tpu.memory_space<vmem>>, vector<8x128xf32>
    %22 = arith.addf %5, %21 : vector<8x128xf32>
    %cst_12 = arith.constant dense<0xFF800000> : vector<8xf32>
    %23 = vector.multi_reduction <maximumf>, %22, %cst_12 [1] : vector<8x128xf32> to vector<8xf32>
    %24 = vector.shape_cast %23 : vector<8xf32> to vector<8x1xf32>
    %25 = vector.broadcast %24 : vector<8x1xf32> to vector<8x128xf32>
    %26 = arith.cmpf oge, %22, %25 : vector<8x128xf32>
    %c128_i32 = arith.constant 128 : i32
    %27 = vector.broadcast %c128_i32 : i32 to vector<8x128xi32>
    %28 = arith.select %26, %20, %27 : vector<8x128xi1>, vector<8x128xi32>
    %cst_13 = arith.constant dense<2147483647> : vector<8xi32>
    %29 = vector.multi_reduction <minsi>, %28, %cst_13 [1] : vector<8x128xi32> to vector<8xi32>
    %30 = vector.shape_cast %29 : vector<8xi32> to vector<8x1xi32>
    %c0_i32 = arith.constant 0 : i32
    %31 = vector.broadcast %c0_i32 : i32 to vector<8x128xi32>
    %32 = arith.cmpi eq, %20, %31 : vector<8x128xi32>
    %c1_i32 = arith.constant 1 : i32
    %33 = vector.broadcast %c1_i32 : i32 to vector<8x128xi32>
    %34 = arith.cmpi eq, %20, %33 : vector<8x128xi32>
    %35 = arith.sitofp %30 : vector<8x1xi32> to vector<8x1xf32>
    %cst_14 = arith.constant 0.000000e+00 : f32
    %36 = vector.shape_cast %35 : vector<8x1xf32> to vector<8x1xf32>
    %37 = vector.broadcast %36 : vector<8x1xf32> to vector<8x128xf32>
    %38 = vector.broadcast %cst_14 : f32 to vector<8x128xf32>
    %39 = arith.select %34, %37, %38 : vector<8x128xi1>, vector<8x128xf32>
    %40 = vector.shape_cast %19 : vector<8x1xf32> to vector<8x1xf32>
    %41 = vector.broadcast %40 : vector<8x1xf32> to vector<8x128xf32>
    %42 = arith.select %32, %41, %39 : vector<8x128xi1>, vector<8x128xf32>
    %c0_15 = arith.constant 0 : index
    %c0_16 = arith.constant 0 : index
    %43 = vector.load %arg6[%c0_15, %c0_16] : memref<8x128xf32, #tpu.memory_space<vmem>>, vector<8x128xf32>
    tpu.vector_store %arg6[%c0_15, %c0_16], %42 {strides = array<i32>} : memref<8x128xf32, #tpu.memory_space<vmem>>, vector<8x128xf32>,
    return
  }
  func.func @transform_0(%arg0: i32) -> (i32, i32) {
    %c0_i32 = arith.constant 0 : i32
    %c0_i32_0 = arith.constant 0 : i32
    return %arg0, %c0_i32 : i32, i32
  }
  func.func @transform_1(%arg0: i32) -> (i32, i32) {
    %c0_i32 = arith.constant 0 : i32
    %c0_i32_0 = arith.constant 0 : i32
    %c0_i32_1 = arith.constant 0 : i32
    return %c0_i32, %c0_i32_0 : i32, i32
  }
  func.func @transform_2(%arg0: i32) -> (i32, i32) {
    %c0_i32 = arith.constant 0 : i32
    %c0_i32_0 = arith.constant 0 : i32
    %c0_i32_1 = arith.constant 0 : i32
    return %c0_i32, %c0_i32_0 : i32, i32
  }
  func.func @transform_3(%arg0: i32) -> (i32, i32) {
    %c0_i32 = arith.constant 0 : i32
    %c0_i32_0 = arith.constant 0 : i32
    return %arg0, %c0_i32 : i32, i32
  }
  func.func @transform_4(%arg0: i32) -> (i32, i32) {
    %c0_i32 = arith.constant 0 : i32
    %c0_i32_0 = arith.constant 0 : i32
    return %arg0, %c0_i32 : i32, i32
  }
  func.func @transform_5(%arg0: i32) -> (i32, i32) {
    %c0_i32 = arith.constant 0 : i32
    %c0_i32_0 = arith.constant 0 : i32
    return %arg0, %c0_i32 : i32, i32
  }
}

</mosaic_0001>

<bundles_post_ra>
// kernel: nvil_forward.1
= control target key start
LH: loop header
LB: loop body
LE: loop exit
PB: predicated region body
PF: predicated region fallthrough
CT: control target
= control target key end

     0   :  { %s1268_s1 = inlined_call_operand.vmem [shape: bf16[1024,128], index: 1, kind: input, shape index: {}]   ;;  %s1269_s0 = inlined_call_operand.vmem [shape: bf16[8,1024], index: 0, kind: input, shape index: {}]   ;;  %s1270_s2 = inlined_call_operand.vmem [shape: f32[1,128], index: 2, kind: input, shape index: {}]   ;;  %s1271_s3 = inlined_call_operand.vmem [shape: f32[8,128], index: 3, kind: input, shape index: {}]   ;;  %s1272_s4 = inlined_call_operand.vmem [shape: f32[8,128], index: 4, kind: output, shape index: {0}]   ;;  %s1273_s5 = inlined_call_operand.vmem [shape: f32[8,128], index: 5, kind: output, shape index: {1}]  }
   0x1   :  { %v944_v0 = vld [vmem:[%s1268_s1 + $0x40] sm:$0xff]   ;;  %v948_v4 = vld [vmem:[%s1268_s1 + $0x48] sm:$0xff]   ;;  %v952_v8 = vld [vmem:[%s1268_s1 + $0x50] sm:$0xff]  }
   0x2   :  { %v945_v1 = vld [vmem:[%s1268_s1 + $0xc0] sm:$0xff]   ;;  %856 = vmatprep.subr.bf16.mxu0 %v944_v0  ;;  %v949_v5 = vld [vmem:[%s1268_s1 + $0xc8] sm:$0xff]   ;;  %v953_v9 = vld [vmem:[%s1268_s1 + $0xd0] sm:$0xff]  }
   0x3   :  { %v946_v2 = vld [vmem:[%s1268_s1] sm:$0xff]   ;;  %878 = vmatprep.subr.bf16.mxu1 %v945_v1  ;;  %v950_v6 = vld [vmem:[%s1268_s1 + $0x8] sm:$0xff]   ;;  %v954_v10 = vld [vmem:[%s1268_s1 + $0x10] sm:$0xff]  }
   0x4   :  { %v947_v3 = vld [vmem:[%s1268_s1 + $0x80] sm:$0xff]   ;;  %857 = vmatpush3.bf16.msra.mxu0 %v946_v2  ;;  %v951_v7 = vld [vmem:[%s1268_s1 + $0x88] sm:$0xff]   ;;  %v955_v11 = vld [vmem:[%s1268_s1 + $0x90] sm:$0xff]  }
   0x5   :  { %879 = vmatpush3.bf16.msra.mxu1 %v947_v3  ;;  %858 = vmatprep.subr.bf16.mxu0 %v948_v4  ;;  %v956_v12 = vld [vmem:[%s1268_s1 + $0x58] sm:$0xff]   ;;  %v960_v16 = vld [vmem:[%s1268_s1 + $0x60] sm:$0xff]   ;;  %v964_v20 = vld [vmem:[%s1268_s1 + $0x68] sm:$0xff]  }
   0x6   :  { %880 = vmatprep.subr.bf16.mxu1 %v949_v5  ;;  %v957_v13 = vld [vmem:[%s1268_s1 + $0xd8] sm:$0xff]   ;;  %v961_v17 = vld [vmem:[%s1268_s1 + $0xe0] sm:$0xff]   ;;  %v965_v21 = vld [vmem:[%s1268_s1 + $0xe8] sm:$0xff]  }
   0x7   :  { %v958_v14 = vld [vmem:[%s1268_s1 + $0x18] sm:$0xff]   ;;  %v962_v18 = vld [vmem:[%s1268_s1 + $0x20] sm:$0xff]   ;;  %v966_v22 = vld [vmem:[%s1268_s1 + $0x28] sm:$0xff]  }
   0x8   :  { %859 = vmatpush3.bf16.msra.mxu0 %v950_v6  ;;  %v959_v15 = vld [vmem:[%s1268_s1 + $0x98] sm:$0xff]   ;;  %v963_v19 = vld [vmem:[%s1268_s1 + $0xa0] sm:$0xff]   ;;  %v967_v23 = vld [vmem:[%s1268_s1 + $0xa8] sm:$0xff]  }
   0x9   :  { %881 = vmatpush3.bf16.msra.mxu1 %v951_v7  ;;  %860 = vmatprep.subr.bf16.mxu0 %v952_v8  ;;  %v968_v24 = vld [vmem:[%s1268_s1 + $0x70] sm:$0xff]   ;;  %v972_v28 = vld [vmem:[%s1268_s1 + $0x78] sm:$0xff]   ;;  %v20_v32 = vld [vmem:[%s1269_s0] sm:$0xff] }
   0xa   :  { %882 = vmatprep.subr.bf16.mxu1 %v953_v9  ;;  %v969_v25 = vld [vmem:[%s1268_s1 + $0xf0] sm:$0xff]   ;;  %v973_v29 = vld [vmem:[%s1268_s1 + $0xf8] sm:$0xff]   ;;  %v21_v33 = vld [vmem:[%s1269_s0 + $0x8] sm:$0xff]  ;;  %v784_v34 = vcombine.low %v20_v32, %v20_v32  ;;  %v785_v35 = vcombine.high %v20_v32, %v20_v32 }
   0xb   :  { %v970_v26 = vld [vmem:[%s1268_s1 + $0x30] sm:$0xff]   ;;  %v974_v30 = vld [vmem:[%s1268_s1 + $0x38] sm:$0xff]   ;;  %v786_v36 = vcombine.low %v21_v33, %v21_v33  ;;  %v787_v37 = vcombine.high %v21_v33, %v21_v33  ;;  %v980_v38 = vld [vmem:[%s1268_s1 + $0x140] sm:$0xff]  }
   0xc   :  { %861 = vmatpush3.bf16.msra.mxu0 %v954_v10  ;;  %v971_v27 = vld [vmem:[%s1268_s1 + $0xb0] sm:$0xff]   ;;  %v975_v31 = vld [vmem:[%s1268_s1 + $0xb8] sm:$0xff]   ;;  %v981_v39 = vld [vmem:[%s1268_s1 + $0x1c0] sm:$0xff]   ;;  %603 = vmatprep.mubr.bf16.mxu0 %v785_v35 }
   0xd   :  { %883 = vmatpush3.bf16.msra.mxu1 %v955_v11  ;;  %862 = vmatprep.subr.bf16.mxu0 %v956_v12  ;;  %v982_v40 = vld [vmem:[%s1268_s1 + $0x100] sm:$0xff]   ;;  %v984_v42 = vld [vmem:[%s1268_s1 + $0x148] sm:$0xff]   ;;  %v988_v46 = vld [vmem:[%s1268_s1 + $0x150] sm:$0xff]  }
   0xe   :  { %884 = vmatprep.subr.bf16.mxu1 %v957_v13  ;;  %643 = vmatprep.mubr.bf16.mxu1 %v787_v37  ;;  %v983_v41 = vld [vmem:[%s1268_s1 + $0x180] sm:$0xff]   ;;  %v985_v43 = vld [vmem:[%s1268_s1 + $0x1c8] sm:$0xff]   ;;  %v989_v47 = vld [vmem:[%s1268_s1 + $0x1d0] sm:$0xff]  }
   0xf   :  { %v986_v44 = vld [vmem:[%s1268_s1 + $0x108] sm:$0xff]   ;;  %v990_v48 = vld [vmem:[%s1268_s1 + $0x110] sm:$0xff]   ;;  %v992_v50 = vld [vmem:[%s1268_s1 + $0x158] sm:$0xff]  }
  0x10   :  { %863 = vmatpush3.bf16.msra.mxu0 %v958_v14  ;;  %v987_v45 = vld [vmem:[%s1268_s1 + $0x188] sm:$0xff]   ;;  %v991_v49 = vld [vmem:[%s1268_s1 + $0x190] sm:$0xff]   ;;  %v993_v51 = vld [vmem:[%s1268_s1 + $0x1d8] sm:$0xff]  }
  0x11   :  { %885 = vmatpush3.bf16.msra.mxu1 %v959_v15  ;;  %864 = vmatprep.subr.bf16.mxu0 %v960_v16  ;;  %v994_v52 = vld [vmem:[%s1268_s1 + $0x118] sm:$0xff]   ;;  %v996_v54 = vld [vmem:[%s1268_s1 + $0x160] sm:$0xff]   ;;  %v1000_v58 = vld [vmem:[%s1268_s1 + $0x168] sm:$0xff]  }
  0x12   :  { %886 = vmatprep.subr.bf16.mxu1 %v961_v17  ;;  %v995_v53 = vld [vmem:[%s1268_s1 + $0x198] sm:$0xff]   ;;  %v997_v55 = vld [vmem:[%s1268_s1 + $0x1e0] sm:$0xff]   ;;  %v1001_v59 = vld [vmem:[%s1268_s1 + $0x1e8] sm:$0xff]  }
  0x13   :  { %v998_v56 = vld [vmem:[%s1268_s1 + $0x120] sm:$0xff]   ;;  %v1002_v60 = vld [vmem:[%s1268_s1 + $0x128] sm:$0xff]   ;;  %v1004_v62 = vld [vmem:[%s1268_s1 + $0x170] sm:$0xff]  }
  0x14   :  { %865 = vmatpush3.bf16.msra.mxu0 %v962_v18  ;;  %v999_v57 = vld [vmem:[%s1268_s1 + $0x1a0] sm:$0xff]   ;;  %v1003_v61 = vld [vmem:[%s1268_s1 + $0x1a8] sm:$0xff]   ;;  %v1005_v63 = vld [vmem:[%s1268_s1 + $0x1f0] sm:$0xff]  }
  0x15   :  { %887 = vmatpush3.bf16.msra.mxu1 %v963_v19  ;;  %866 = vmatprep.subr.bf16.mxu0 %v964_v20  ;;  %v1006_v0 = vld [vmem:[%s1268_s1 + $0x130] sm:$0xff]   ;;  %v1008_v2 = vld [vmem:[%s1268_s1 + $0x178] sm:$0xff]   ;;  %v783_v14 = vld [vmem:[%s1270_s2] ss:$0 sm:$0xff] }
  0x16   :  { %888 = vmatprep.subr.bf16.mxu1 %v965_v21  ;;  %v1007_v1 = vld [vmem:[%s1268_s1 + $0x1b0] sm:$0xff]   ;;  %v1009_v3 = vld [vmem:[%s1268_s1 + $0x1f8] sm:$0xff]  }
  0x17   :  { %v1010_v4 = vld [vmem:[%s1268_s1 + $0x138] sm:$0xff]   ;;  %v22_v6 = vld [vmem:[%s1269_s0 + $0x10] sm:$0xff] }
  0x18   :  { %867 = vmatpush3.bf16.msra.mxu0 %v966_v22  ;;  %v1011_v5 = vld [vmem:[%s1268_s1 + $0x1b8] sm:$0xff]   ;;  %v788_v7 = vcombine.low %v22_v6, %v22_v6  ;;  %v789_v8 = vcombine.high %v22_v6, %v22_v6 }
  0x19   :  { %889 = vmatpush3.bf16.msra.mxu1 %v967_v23  ;;  %868 = vmatprep.subr.bf16.mxu0 %v968_v24  ;;  %v23_v9 = vld [vmem:[%s1269_s0 + $0x18] sm:$0xff] }
  0x1a   :  { %890 = vmatprep.subr.bf16.mxu1 %v969_v25  ;;  %v790_v10 = vcombine.low %v23_v9, %v23_v9  ;;  %v791_v11 = vcombine.high %v23_v9, %v23_v9 }
  0x1c   :  { %869 = vmatpush3.bf16.msra.mxu0 %v970_v26 }
  0x1d   :  { %891 = vmatpush3.bf16.msra.mxu1 %v971_v27  ;;  %870 = vmatprep.subr.bf16.mxu0 %v972_v28 }
  0x1e   :  { %892 = vmatprep.subr.bf16.mxu1 %v973_v29 }
  0x20   :  { %871 = vmatpush3.bf16.msra.mxu0 %v974_v30 }
  0x21   :  { %893 = vmatpush3.bf16.msra.mxu1 %v975_v31  ;;  %900 = vmatprep.subr.bf16.mxu0 %v980_v38 }
  0x22   :  { %922 = vmatprep.subr.bf16.mxu1 %v981_v39  ;;  %v747_v39 = vlaneseq }
  0x23   :  { %604 = vmatmul.mubr.bf16.vlgmr.msra.gmra.mrb[0].mxu0 %v784_v34 }
  0x24   :  { %644 = vmatmul.mubr.bf16.vlgmr.msra.gmra.mrb[0].mxu1 %v786_v36  ;;  %901 = vmatpush3.bf16.msra.mxu0 %v982_v40  ;;  %v749_v36 = vld [vmem:[%s1271_s3] sm:$0xff]  ;;  %v748_v40 = vand.u32 127, %v747_v39 }
  0x25   :  { %923 = vmatpush3.bf16.msra.mxu1 %v983_v41  ;;  %902 = vmatprep.subr.bf16.mxu0 %v984_v42 }
  0x26   :  { %924 = vmatprep.subr.bf16.mxu1 %v985_v43  ;;  %683 = vmatprep.mubr.bf16.mxu0 %v789_v8  ;;  %vm770_vm2 = vcmp.eq.s32.totalorder %v748_v40, 1  ;;  %vm769_vm3 = vcmp.eq.s32.totalorder %v748_v40, 0 }
  0x27   :  { %723 = vmatprep.mubr.bf16.mxu1 %v791_v11 }
  0x28   :  { %903 = vmatpush3.bf16.msra.mxu0 %v986_v44 }
  0x29   :  { %925 = vmatpush3.bf16.msra.mxu1 %v987_v45  ;;  %904 = vmatprep.subr.bf16.mxu0 %v988_v46 }
  0x2a   :  { %926 = vmatprep.subr.bf16.mxu1 %v989_v47 }
  0x2c   :  { %905 = vmatpush3.bf16.msra.mxu0 %v990_v48 }
  0x2d   :  { %927 = vmatpush3.bf16.msra.mxu1 %v991_v49  ;;  %906 = vmatprep.subr.bf16.mxu0 %v992_v50 }
  0x2e   :  { %928 = vmatprep.subr.bf16.mxu1 %v993_v51 }
  0x30   :  { %907 = vmatpush3.bf16.msra.mxu0 %v994_v52 }
  0x31   :  { %929 = vmatpush3.bf16.msra.mxu1 %v995_v53  ;;  %908 = vmatprep.subr.bf16.mxu0 %v996_v54 }
  0x32   :  { %930 = vmatprep.subr.bf16.mxu1 %v997_v55 }
  0x34   :  { %909 = vmatpush3.bf16.msra.mxu0 %v998_v56 }
  0x35   :  { %931 = vmatpush3.bf16.msra.mxu1 %v999_v57  ;;  %910 = vmatprep.subr.bf16.mxu0 %v1000_v58 }
  0x36   :  { %932 = vmatprep.subr.bf16.mxu1 %v1001_v59 }
  0x38   :  { %911 = vmatpush3.bf16.msra.mxu0 %v1002_v60 }
  0x39   :  { %933 = vmatpush3.bf16.msra.mxu1 %v1003_v61  ;;  %912 = vmatprep.subr.bf16.mxu0 %v1004_v62 }
  0x3a   :  { %934 = vmatprep.subr.bf16.mxu1 %v1005_v63 }
  0x3c   :  { %913 = vmatpush3.bf16.msra.mxu0 %v1006_v0 }
  0x3d   :  { %935 = vmatpush3.bf16.msra.mxu1 %v1007_v1  ;;  %914 = vmatprep.subr.bf16.mxu0 %v1008_v2 }
  0x3e   :  { %936 = vmatprep.subr.bf16.mxu1 %v1009_v3 }
  0x40   :  { %915 = vmatpush3.bf16.msra.mxu0 %v1010_v4 }
  0x41   :  { %937 = vmatpush3.bf16.msra.mxu1 %v1011_v5 }
  0x43   :  { %684 = vmatmul.mubr.bf16.vlgmr.msra.gmra.mrb[4].mxu0 %v788_v7 }
  0x44   :  { %724 = vmatmul.mubr.bf16.vlgmr.msra.gmra.mrb[4].mxu1 %v790_v10 }
  0xf6   :  { %v872_v12 = vpop.f32.mrb[0].mxu0 }
  0xf7   :  { %v894_v13 = vpop.f32.mrb[0].mxu1  ;;  %v873_v15 = vpop.f32.mrb[1].mxu0 }
  0xf8   :  { %v895_v16 = vpop.f32.mrb[1].mxu1  ;;  %v874_v17 = vadd.f32 %v873_v15, %v872_v12  ;;  %v875_v19 = vpop.f32.mrb[2].mxu0 }
  0xf9   :  { %v896_v18 = vadd.f32 %v895_v16, %v894_v13  ;;  %v897_v20 = vpop.f32.mrb[2].mxu1  ;;  %v876_v21 = vpop.f32.mrb[3].mxu0 }
  0xfa   :  { %v898_v22 = vpop.f32.mrb[3].mxu1  ;;  %v606_v23 = vadd.f32 %v874_v17, %v783_v14 }
  0xfc   :  { %v646_v24 = vadd.f32 %v896_v18, %v606_v23 }
 0x116   :  { %v916_v25 = vpop.f32.mrb[4].mxu0 }
 0x117   :  { %v938_v26 = vpop.f32.mrb[4].mxu1  ;;  %v917_v27 = vpop.f32.mrb[5].mxu0 }
 0x118   :  { %v939_v28 = vpop.f32.mrb[5].mxu1  ;;  %v918_v29 = vadd.f32 %v917_v27, %v916_v25  ;;  %v919_v31 = vpop.f32.mrb[6].mxu0 }
 0x119   :  { %v940_v30 = vadd.f32 %v939_v28, %v938_v26  ;;  %v941_v32 = vpop.f32.mrb[6].mxu1  ;;  %v920_v33 = vpop.f32.mrb[7].mxu0 }
 0x11a   :  { %v942_v34 = vpop.f32.mrb[7].mxu1  ;;  %v686_v35 = vadd.f32 %v918_v29, %v646_v24 }
 0x11c   :  { %v726_v37 = vadd.f32 %v940_v30, %v686_v35 }
 0x11e   :  { %731 = vst [vmem:[%s1272_s4] sm:$0xff] %v726_v37  ;;  %v750_v38 = vadd.f32 %v749_v36, %v726_v37 }
 0x120   :  { %751 = vmax.xlane.f32.xlu0 %v750_v38 }
 0x124   :  { %732 = vmax.xlane.f32.xlu0 %v726_v37 }
 0x1ad   :  { %v752_v41 = vpop.xlane.xlu0 %751 }
 0x1ae   :  { %vm753_vm0 = vcmp.ge.f32.partialorder %v750_v38, %v752_v41 }
 0x1af   :  { %v754_v42 = vsel %vm753_vm0, %v748_v40, 128 }
 0x1b0   :  { %v756_v43 = vshra.s32 %v754_v42, 16  ;;  %v755_v50 = vand.u32 65535, %v754_v42 }
 0x1b1   :  { %v733_v44 = vpop.xlane.xlu0 %732 }
 0x1b2   :  { %v734_v45 = vsub.f32 %v726_v37, %v733_v44  ;;  %v758_v46 = vcvt.s32.f32 %v756_v43  ;;  %v757_v52 = vcvt.s32.f32 %v755_v50 }
 0x1b4   :  { %v735_v47 = vmul.f32 1.442695, %v734_v45  ;;  %759 = vmin.xlane.f32.xlu1 %v758_v46 }
 0x1b6   :  { %1016 = vpow2.f32 %v735_v47 }
 0x1c0   :  { %v1017_v48 = vpop.eup %1016 }
 0x1c1   :  { %737 = vadd.xlane.f32.xlu1 %v1017_v48  ;;  %v741_v49 = vmul.f32 %v1017_v48, %v734_v45 }
 0x1c5   :  { %742 = vadd.xlane.f32.xlu1 %v741_v49 }
 0x241   :  { %v760_v51 = vpop.xlane.xlu1 %759 }
 0x242   :  { %vm761_vm1 = vcmp.eq.f32.partialorder %v758_v46, %v760_v51  ;;  %v766_v55 = vcvt.f32.s32 %v760_v51 }
 0x243   :  { %v762_v53 = vsel %vm761_vm1, %v757_v52, inf }
 0x244   :  { %763 = vmin.xlane.f32.xlu0 %v762_v53  ;;  %v767_v59 = vshll.u32 %v766_v55, 16 }
 0x24e   :  { %v738_v54 = vpop.xlane.xlu1 %737 }
 0x24f   :  { %1018 = vlog2.f32 %v738_v54 }
 0x250   :  { %1020 = vrcp.f32 %v738_v54 }
 0x252   :  { %v743_v60 = vpop.xlane.xlu1 %742 }
 0x259   :  { %v1019_v56 = vpop.eup %1018 }
 0x25a   :  { %v1021_v57 = vpop.eup %1020  ;;  %v740_v62 = vmul.f32 0.6931472, %v1019_v56 }
 0x25b   :  { %v745_v63 = vmul.f32 %v1021_v57, %v743_v60 }
 0x25d   :  { %v746_v2 = vsub.f32 %v740_v62, %v745_v63 }
 0x2d1   :  { %v764_v58 = vpop.xlane.xlu0 %763 }
 0x2d2   :  { %v765_v61 = vcvt.f32.s32 %v764_v58 }
 0x2d4   :  { %v768_v0 = vadd.s32 %v767_v59, %v765_v61 }
 0x2d6   :  { %v771_v1 = vcvt.s32.f32 %v768_v0 }
 0x2d8   :  { %v772_v3 = vsel %vm770_vm2, %v771_v1, 0.0 }
 0x2d9   :  { %v773_v4 = vsel %vm769_vm3, %v746_v2, %v772_v3 }
 0x2da   :  { %774 = vst [vmem:[%s1273_s5] sm:$0xff] %v773_v4 }

</bundles_post_ra>
